<compile_context>
chip_gen: v7x
topology: tpu7x:2x2x1
jax: 0.10.0
libtpu: 0.0.40
codegen_flags: <defaults>
</compile_context>

<pallas_src>
import functools

import jax
import jax.numpy as jnp
from jax.experimental import pallas as pl
from jax.experimental.pallas import tpu as pltpu


def _linear_kernel(x_ref, w_ref, b_ref, o_ref, *, apply_relu):
    """One (tm, tn) output tile; single full-K MXU pass, f32 accumulation."""
    y = jnp.dot(
        x_ref[...].astype(jnp.bfloat16),   # MXU is bf16-native; acc stays f32
        w_ref[...],
        preferred_element_type=jnp.float32,
    )
    y = y + b_ref[...]                     # bias broadcasts over rows
    if apply_relu:
        y = jnp.maximum(y, 0.0)
    o_ref[...] = y.astype(o_ref.dtype)


def pallas_linear(x, w, b, *, apply_relu):
    """y = (relu)(x @ w + b).  x: (M, K) f32, w: (K, N) bf16, b: (N,) f32."""
    M, K = x.shape
    K2, N = w.shape
    assert K == K2 and b.shape == (N,)
    assert M % 8 == 0 and N % 128 == 0

    # Largest tm that divides M (M is small here; >=256 only matters when the
    # kernel becomes compute-bound at large batch).
    tm = 8
    for cand in (256, 128, 64, 32, 16, 8):
        if M % cand == 0:
            tm = cand
            break

    # Prefer 2 parallel steps along N (megacore on v7x); cap the
    # double-buffered bf16 weight tile at ~8 MiB.
    tn = N // 2 if (N // 2) % 128 == 0 else N
    while K * tn * 2 * 2 > 8 * 1024 * 1024 and tn % 256 == 0:
        tn //= 2
    assert N % tn == 0 and tn % 128 == 0

    b2 = b.reshape(1, N)

    kernel = functools.partial(_linear_kernel, apply_relu=apply_relu)
    return pl.pallas_call(
        kernel,
        out_shape=jax.ShapeDtypeStruct((M, N), jnp.float32),
        grid_spec=pltpu.PrefetchScalarGridSpec(
            num_scalar_prefetch=0,
            grid=(M // tm, N // tn),
            in_specs=[
                pl.BlockSpec((tm, K), lambda i, j: (i, 0)),
                pl.BlockSpec((K, tn), lambda i, j: (0, j)),
                pl.BlockSpec((1, tn), lambda i, j: (0, j)),
            ],
            out_specs=pl.BlockSpec((tm, tn), lambda i, j: (i, j)),
        ),
        compiler_params=pltpu.CompilerParams(
            dimension_semantics=("parallel", "parallel"),
            vmem_limit_bytes=32 * 1024 * 1024,
        ),
    )(x, w, b2)


def init_linear(key, fan_in, fan_out):
    """Deterministic init mimicking nn.Linear defaults (uniform +-1/sqrt(fan_in)).

    Returns the weight already transposed to (fan_in, fan_out), as bf16."""
    kw, kb = jax.random.split(key)
    bound = 1.0 / jnp.sqrt(fan_in)
    w = jax.random.uniform(kw, (fan_in, fan_out), jnp.float32, -bound, bound)
    b = jax.random.uniform(kb, (fan_out,), jnp.float32, -bound, bound)
    return w.astype(jnp.bfloat16), b


def make_dnn_params(key, stack_num, n_freq, n_hid=2048, n_out=257):
    in_dim = stack_num * n_freq
    k1, k2, k3, k4 = jax.random.split(key, 4)
    p = {}
    p["fc1"] = init_linear(k1, in_dim, n_hid)
    p["fc2"] = init_linear(k2, n_hid, n_hid)
    p["fc3"] = init_linear(k3, n_hid, n_hid)
    # fc4 output (257) is not lane-aligned; zero-pad the weight/bias columns to
    # 512 (lane-dense, 2 parallel N steps) and slice back to 257 in the wrapper.
    w4, b4 = init_linear(k4, n_hid, n_out)
    n_pad = ((n_out + 255) // 256) * 256
    w4p = jnp.zeros((n_hid, n_pad), jnp.bfloat16).at[:, :n_out].set(w4)
    b4p = jnp.zeros((n_pad,), jnp.float32).at[:n_out].set(b4)
    p["fc4"] = (w4p, b4p)
    p["n_out"] = n_out
    return p


def dnn_forward(params, x):
    """x: (B, stack_num, n_freq) -> (B, 257).  Eval mode, BN=False path."""
    B = x.shape[0]
    x = x.reshape(B, -1).astype(jnp.float32)

    # Pad batch to a multiple of 8 (sublane granularity); sliced back below.
    M = ((B + 7) // 8) * 8
    if M != B:
        x = jnp.pad(x, ((0, M - B), (0, 0)))

    w1, b1 = params["fc1"]
    w2, b2 = params["fc2"]
    w3, b3 = params["fc3"]
    w4, b4 = params["fc4"]

    x2 = pallas_linear(x, w1, b1, apply_relu=True)   # dropout(p=0.2, eval) == id
    x3 = pallas_linear(x2, w2, b2, apply_relu=True)
    x4 = pallas_linear(x3, w3, b3, apply_relu=True)
    x5 = pallas_linear(x4, w4, b4, apply_relu=False)
    return x5[:B, : params["n_out"]]


if __name__ == "__main__":
    key = jax.random.PRNGKey(0)
    k_param, k_x = jax.random.split(key)

    # Small, module-consistent shapes: batch=8, stack_num=3, n_freq=64.
    B, stack_num, n_freq = 8, 3, 64
    params = make_dnn_params(k_param, stack_num, n_freq)
    x = jax.random.normal(k_x, (B, stack_num, n_freq), jnp.float32)

    out = dnn_forward(params, x)
    out = jax.block_until_ready(out)

    assert out.shape == (B, 257), out.shape
    assert out.dtype == jnp.float32

    # Sanity check against a pure-JAX reference with the same bf16 weights /
    # f32 accumulation.
    def ref_linear(h, w, b, relu):
        y = jnp.dot(h.astype(jnp.bfloat16), w,
                    preferred_element_type=jnp.float32) + b
        return jnp.maximum(y, 0.0) if relu else y

    xf = x.reshape(B, -1)
    ref = ref_linear(xf, *params["fc1"], True)
    ref = ref_linear(ref, *params["fc2"], True)
    ref = ref_linear(ref, *params["fc3"], True)
    ref = ref_linear(ref, *params["fc4"], False)[:, :257]
    assert jnp.allclose(out, ref, atol=1e-2, rtol=1e-2)

    print("KERNEL_OK")
</pallas_src>

<mosaic_0001>
module attributes {stable_mosaic.version = 11 : i64} {
  func.func @_linear_kernel(%arg0: i32, %arg1: i32, %arg2: memref<8x192xf32, #tpu.memory_space<vmem>>, %arg3: memref<192x1024xbf16, #tpu.memory_space<vmem>>, %arg4: memref<1x1024xf32, #tpu.memory_space<vmem>>, %arg5: memref<8x1024xf32, #tpu.memory_space<vmem>>) attributes {dimension_semantics = [#tpu.dimension_semantics<parallel>, #tpu.dimension_semantics<parallel>], iteration_bounds = array<i64: 1, 2>, scalar_prefetch = 0 : i64, scratch_operands = 0 : i64, tpu.core_type = #tpu.core_type<tc>, window_params = [{transform_indices = @transform_0, window_bounds = array<i64: 8, 192>}, {transform_indices = @transform_1, window_bounds = array<i64: 192, 1024>}, {transform_indices = @transform_2, window_bounds = array<i64: 1, 1024>}, {transform_indices = @transform_3, window_bounds = array<i64: 8, 1024>}]} {
    %c0 = arith.constant 0 : index
    %c0_0 = arith.constant 0 : index
    %0 = vector.load %arg2[%c0, %c0_0] : memref<8x192xf32, #tpu.memory_space<vmem>>, vector<8x192xf32>
    %1 = arith.truncf %0 : vector<8x192xf32> to vector<8x192xbf16>
    %c0_1 = arith.constant 0 : index
    %c0_2 = arith.constant 0 : index
    %2 = vector.load %arg3[%c0_1, %c0_2] : memref<192x1024xbf16, #tpu.memory_space<vmem>>, vector<192x1024xbf16>
    %cst = arith.constant dense<0.000000e+00> : vector<8x1024xf32>
    %3 = tpu.matmul %1, %2, %cst {dimension_numbers = #tpu.dot_dimension_numbers<[1], [0], [0], [1], [0, 0, 1, 1], [], []>} : vector<8x192xbf16>, vector<192x1024xbf16>, vector<8x1024xf32> -> vector<8x1024xf32>
    %c0_3 = arith.constant 0 : index
    %c0_4 = arith.constant 0 : index
    %4 = vector.load %arg4[%c0_3, %c0_4] : memref<1x1024xf32, #tpu.memory_space<vmem>>, vector<1x1024xf32>
    %5 = vector.broadcast %4 : vector<1x1024xf32> to vector<8x1024xf32>
    %6 = arith.addf %3, %5 : vector<8x1024xf32>
    %cst_5 = arith.constant 0.000000e+00 : f32
    %7 = vector.broadcast %cst_5 : f32 to vector<8x1024xf32>
    %8 = arith.maximumf %6, %7 : vector<8x1024xf32>
    %c0_6 = arith.constant 0 : index
    %c0_7 = arith.constant 0 : index
    %9 = vector.load %arg5[%c0_6, %c0_7] : memref<8x1024xf32, #tpu.memory_space<vmem>>, vector<8x1024xf32>
    tpu.vector_store %arg5[%c0_6, %c0_7], %8 {strides = array<i32>} : memref<8x1024xf32, #tpu.memory_space<vmem>>, vector<8x1024xf32>,
    return
  }
  func.func @transform_0(%arg0: i32, %arg1: i32) -> (i32, i32) {
    %c0_i32 = arith.constant 0 : i32
    %c0_i32_0 = arith.constant 0 : i32
    return %arg0, %c0_i32 : i32, i32
  }
  func.func @transform_1(%arg0: i32, %arg1: i32) -> (i32, i32) {
    %c0_i32 = arith.constant 0 : i32
    %c0_i32_0 = arith.constant 0 : i32
    return %c0_i32, %arg1 : i32, i32
  }
  func.func @transform_2(%arg0: i32, %arg1: i32) -> (i32, i32) {
    %c0_i32 = arith.constant 0 : i32
    %c0_i32_0 = arith.constant 0 : i32
    return %c0_i32, %arg1 : i32, i32
  }
  func.func @transform_3(%arg0: i32, %arg1: i32) -> (i32, i32) {
    %c0_i32 = arith.constant 0 : i32
    return %arg0, %arg1 : i32, i32
  }
}

</mosaic_0001>

<bundles_post_ra>
// kernel: tpu_custom_call.1
= control target key start
LH: loop header
LB: loop body
LE: loop exit
PB: predicated region body
PF: predicated region fallthrough
CT: control target
= control target key end

     0   :  { %s1985_s0 = inlined_call_operand.hbm [shape: f32[8,192], index: 0, kind: input, shape index: {}]   ;;  %s1986_s1 = inlined_call_operand.hbm [shape: bf16[192,2048], index: 1, kind: input, shape index: {}]   ;;  %s1987_s2 = inlined_call_operand.hbm [shape: f32[1,2048], index: 2, kind: input, shape index: {}]   ;;  %s1988_s3 = inlined_call_operand.hbm [shape: f32[8,2048], index: 3, kind: output, shape index: {}]  }
   0x1   :  { %1994 = sst [smem:[#allocation12_spill]] %s1986_s1 }
   0x2   :  { %8 = vsyncpa [#allocation3], 0 }
   0x3   :  { %9 = vsyncpa [#allocation6], 0 }
   0x4   :  { %11 = vsyncpa [#allocation6 + $0x1], 0 }
   0x5   :  { %12 = vsyncpa [#allocation4], 0 }
   0x6   :  { %14 = vsyncpa [#allocation4 + $0x1], 0  ;;  %s1609_s12 = smov 0   ;;  %s1611_s13 = smov 0  }
   0x7   :  { %s1613_s14 = smov 0   ;;  %s1615_s15 = smov 0  }
   0x8   :  { %s1617_s16 = smov 0   ;;  %s1619_s17 = smov 0  }
   0x9 LB: > { %s29_s18 = sadd.s32 1, %s1576_s16  ;;  %s65_s19 = sadd.s32 1, %s1568_s14  ;;  %s1580_s17 = sphi %s1619_s17, %s20_s17   ;;  %s1576_s16 = sphi %s1617_s16, %s2014_s16   ;;  %s1572_s15 = sphi %s1615_s15, %s2013_s15   ;;  %s1568_s14 = sphi %s1613_s14, %s2012_s14   ;;  %s1564_s13 = sphi %s1611_s13, %s2011_s13   ;;  %s1560_s12 = sphi %s1609_s12, %s2010_s12  }
   0xa   : > { %p30_p0 = scmp.ge.s32.totalorder %s29_s18, 2  ;;  %p72_p1 = scmp.ne.s32.totalorder %s1568_s14, %s1564_s13 }
   0xb   : > { %p73_p2 = scmp.eq.s32.totalorder %s1580_s17, 0  ;;  %p1351_p5 = scmp.lt.s32.totalorder %s1580_s17, 2 }
   0xc   : > { %s2016_s18 = smov (%p30_p0, %s29_s18), 0  ;;  %s170_s21 = sand.u32 1, %s1580_s17  }
   0xd   : > { %p74_p4 = por %p73_p2, %p72_p1  ;;  %s62_s20 = ssub.s32 %s1576_s16, %s2016_s18 }
   0xe   : > { %p63_p6 = scmp.eq.s32.totalorder %s62_s20, 0  ;;  %s172_s22 = sand.u32 1, %s1568_s14  }
   0xf   : > { %s1320_s23 = sshll.u32 %s1576_s16, 9  ;;  %s1323_s25 = smul.u32 768, %s172_s22 }
  0x10   : > { %s1657_s24 = scalar_select %p63_p6, %s1568_s14, %s65_s19  }
  0x11   : > { %s1995_s1 = sld [smem:[#allocation12_spill]]  ;;  %p1666_p7 = pnand %p1351_p5, %p74_p4 }
  0x12   : > { %s174_s30 = scalar_lea.vmem [#allocation5], %s1323_s25  ;;  %s1672_s5 = scalar_lea.sflag [#allocation6], %s170_s21 }
  0x13   : > { %s181_s4 = sshll.u32 %s174_s30, 4  ;;  %p1408_p9 = pneg %p1666_p7  ;;  %s1670_s4 = int_to_ptr.vmem [resolvable:$true] %s181_s4 }
  0x17   : > { %s1664_s28 = scalar_lea.hbm %s1995_s1, %s1320_s23  ;;  %s1411_s9 = scalar_lea.hbm %s1995_s1, 24576 }
  0x18   : > { %s1406_s6 = scalar_lea.hbm %s1664_s28, 12288  ;;  %p1412_p12 = scmp.lt.u32.totalorder %s1664_s28, %s1995_s1 }
  0x19   : > { %p1407_p8 = scmp.ne.s32.totalorder %s1664_s28, %s1406_s6  ;;  %p1413_p13 = scmp.lt.u32.totalorder %s1411_s9, %s1406_s6 }
  0x1a   : > { %p1415_p2 = scmp.lt.u32.totalorder %s1406_s6, %s1664_s28 }
  0x1b   : > { %p1409_p10 = pnand %p1408_p9, %p1407_p8  ;;  %p1414_p0 = por %p1413_p13, %p1412_p12 }
  0x1d   : > { %p1410_p11 = pneg %p1409_p10  ;;  %p1416_p4 = por %p1415_p2, %p1414_p0 }
  0x1f   : > { %p1417_p5 = pnand %p1416_p4, %p1410_p11 }
  0x21   : > { %1420 = shalt.err (!%p1417_p5)
}
  0x22   : > { %s1421_s19 = scalar_lea.vmem %s1670_s4, 12288  ;;  %s1582_s20 = smov [#allocation5]  }
  0x23   : > { %p1422_p6 = scmp.ne.s32.totalorder %s1670_s4, %s1421_s19  ;;  %s1426_s21 = sshll.u32 %s1582_s20, 4  ;;  %s1427_s21 = int_to_ptr.vmem [resolvable:$false] %s1426_s21 }
  0x24   : > { %s1428_s23 = scalar_lea.vmem %s1427_s21, 24576  ;;  %p1429_p3 = scmp.lt.s32.totalorder %s1670_s4, %s1427_s21 }
  0x25   : > { %p1424_p8 = pnand %p1422_p6, %p1408_p9  ;;  %p1430_p12 = scmp.lt.s32.totalorder %s1428_s23, %s1421_s19 }
  0x27   : > { %p1425_p10 = pneg %p1424_p8  ;;  %p1431_p13 = por %p1430_p12, %p1429_p3 }
  0x29   : > { %p1432_p0 = pnand %p1431_p13, %p1425_p10 }
  0x2b   : > { %1435 = shalt.err (!%p1432_p0)
}
  0x2c   : > { %s1583_s25 = smov 1024   ;;  %s1584_s26 = smov 512  }
  0x2d   : > { %s1585_s27 = smov 32   ;;  %s1701_s30 = sadd.s32 4294967295, %s1580_s17  }
  0x2e   : > { %1342 = dma.hbm_to_vmem [thread:$0]  (!%p1666_p7), %s1664_s28, 12288, %s1670_s4, %s1672_s5, %s1583_s25, %s1584_s26, %s1585_s27  }
  0x2f   : > { %s1202_s6 = sadd.s32 4294967294, %s1580_s17   ;;  %p78_p3 = scmp.ne.s32.totalorder %s1564_s13, %s1560_s12 }
  0x30   : > { %p1989_p11 = scmp.eq.s32.totalorder %s1701_s30, 0  ;;  %p130_p2 = scmp.eq.s32.totalorder %s1701_s30, 1 }
  0x31   : > { %p136_p4 = scmp.eq.s32.totalorder %s1202_s6, 1  ;;  %p1203_p6 = scmp.ge.s32.totalorder %s1580_s17, 1 }
  0x32   : > { %p1710_p5 = por %p1989_p11, %p78_p3  ;;  %p1718_p8 = por %p130_p2, %p72_p1 }
  0x33   : > { %p1722_p10 = por %p136_p4, %p78_p3  ;;  %p143_p12 = scmp.lt.s32.totalorder %s1580_s17, 3 }
  0x34   : > { %s1997_s7 = scalar_select %p1710_p5, 1, 0 }
  0x35   : > { %s1998_s28 = scalar_select %p1718_p8, 1, 0 }
  0x36   : > { %s1999_s4 = scalar_select %p1722_p10, 1, 0 }
  0x37   : > { %s1208_s8 = sshll.u32 %s172_s22, 3  ;;  %p1729_p13 = pnand %p1203_p6, %p143_p12 }
  0x38   : > { %s1586_s10 = smov [#allocation2]   ;;  %s1321_s19 = sshll.u32 %s1576_s16, 7 }
  0x39   : > { %s2000_s9 = scalar_select %p1729_p13, 1, 0 }
  0x3a   : > { %s159_s11 = sshll.u32 %s1586_s10, 4  ;;  %p1335_p1 = pneg %p1729_p13  ;;  %s1733_s11 = int_to_ptr.vmem [resolvable:$true] %s159_s11 }
  0x3b   : > { %s1741_s23 = scalar_lea.hbm %s1987_s2, %s1321_s19  ;;  %s195_s22 = scalar_lea.vmem [#allocation7], %s1208_s8 }
  0x3c   : > { %s203_s25 = sshll.u32 %s195_s22, 4  ;;  %p1745_p0 = pnand %p1335_p1, %p1989_p11  ;;  %s204_s25 = int_to_ptr.vmem [resolvable:$true] %s203_s25 }
  0x3d   : > { %s1436_s27 = scalar_lea.hbm %s1741_s23, 128  ;;  %s1441_s19 = scalar_lea.hbm %s1987_s2, 256 }
  0x3e   : > { %s2001_s26 = scalar_select %p1745_p0, 1, 0 }
  0x3f   : > { %p1437_p3 = scmp.ne.s32.totalorder %s1741_s23, %s1436_s27  ;;  %p1442_p6 = scmp.lt.u32.totalorder %s1741_s23, %s1987_s2 }
  0x40   : > { %p1443_p12 = scmp.lt.u32.totalorder %s1441_s19, %s1436_s27  ;;  %p1445_p11 = scmp.lt.u32.totalorder %s1436_s27, %s1741_s23 }
  0x41   : > { %p1439_p2 = pnand %p1437_p3, %p1408_p9 }
  0x42   : > { %p1444_p1 = por %p1443_p12, %p1442_p6 }
  0x43   : > { %p1440_p4 = pneg %p1439_p2 }
  0x44   : > { %p1446_p10 = por %p1445_p11, %p1444_p1 }
  0x46   : > { %p1447_p8 = pnand %p1446_p10, %p1440_p4 }
  0x48   : > { %1450 = shalt.err (!%p1447_p8)
}
  0x49   : > { %s1451_s8 = scalar_lea.vmem %s204_s25, 128  ;;  %s1587_s22 = smov [#allocation7]  }
  0x4a   : > { %p1452_p5 = scmp.ne.s32.totalorder %s204_s25, %s1451_s8  ;;  %s1456_s6 = sshll.u32 %s1587_s22, 4  ;;  %s1457_s6 = int_to_ptr.vmem [resolvable:$false] %s1456_s6 }
  0x4b   : > { %s1458_s10 = scalar_lea.vmem %s1457_s6, 256  ;;  %p1459_p13 = scmp.lt.s32.totalorder %s204_s25, %s1457_s6 }
  0x4c   : > { %p1454_p3 = pnand %p1452_p5, %p1408_p9  ;;  %p1460_p0 = scmp.lt.s32.totalorder %s1458_s10, %s1451_s8 }
  0x4e   : > { %p1455_p2 = pneg %p1454_p3  ;;  %p1461_p6 = por %p1460_p0, %p1459_p13 }
  0x50   : > { %p1462_p12 = pnand %p1461_p6, %p1455_p2 }
  0x52   : > { %1465 = shalt.err (!%p1462_p12)
}
  0x53   : > { %1345 = dma.hbm_to_vmem [thread:$0]  (!%p1666_p7), %s1741_s23, 128, %s204_s25, %s1672_s5  }
  0x54   : > { %s1466_s20 = scalar_lea.hbm %s1985_s0, 256  ;;  %p2002_p11 = scmp.ne.s32.totalorder %s2001_s26, 0 }
  0x55   : > { %p1467_p9 = scmp.ne.s32.totalorder %s1985_s0, %s1466_s20  ;;  %p1473_p13 = scmp.lt.u32.totalorder %s1466_s20, %s1985_s0 }
  0x56   : > { %p1468_p5 = pneg %p2002_p11 }
  0x58   : > { %p1469_p8 = pnand %p1468_p5, %p1467_p9 }
  0x5a   : > { %p1470_p10 = pneg %p1469_p8 }
  0x5c   : > { %p1475_p0 = pnand %p1473_p13, %p1470_p10 }
  0x5e   : > { %1478 = shalt.err (!%p1475_p0)
}
  0x5f   : > { %s1479_s29 = scalar_lea.vmem %s1733_s11, 256  ;;  %p1487_p3 = scmp.lt.s32.totalorder %s1733_s11, %s1733_s11 }
  0x60   : > { %p1480_p7 = scmp.ne.s32.totalorder %s1733_s11, %s1479_s29  ;;  %p1488_p2 = scmp.lt.s32.totalorder %s1479_s29, %s1479_s29 }
  0x62   : > { %p1482_p4 = pnand %p1480_p7, %p1468_p5  ;;  %p1489_p6 = por %p1488_p2, %p1487_p3 }
  0x64   : > { %p1483_p1 = pneg %p1482_p4 }
  0x66   : > { %p1490_p12 = pnand %p1489_p6, %p1483_p1 }
  0x68   : > { %1493 = shalt.err (!%p1490_p12)
}
  0x69   : > { %1338 = dma.hbm_to_vmem [thread:$0]  (!%p2002_p11), %s1985_s0, 256, %s1733_s11, [#allocation3]  }
  0x6a   : > { %p2003_p9 = scmp.ne.s32.totalorder %s2000_s9, 0 }
  0x6b   : > { %p2004_p8 = scmp.eq.s32.totalorder (!%p2003_p9), %s1701_s30, 0 }
  0x6c   : > { %212 = sbr.rel (%p2003_p9) target bundleno = 452 (0x1c4), region = 32 }
  0x73   : > { %1547 = dma.done.wait (%p2004_p8), [#allocation3], 256   ;;  %p2005_p5 = pmov %p2004_p8 }
  0x74   : > { %s218_s23 = sand.u32 1, %s1701_s30   ;;  %s1798_s25 = sand.u32 1, %s1564_s13  }
  0x75   : > { %1549 = vsyncadd (%p2005_p5), [#allocation3], 4294967040  ;;  %s1324_s26 = smul.u32 768, %s1798_s25  ;;  %s219_s6 = scalar_lea.sflag [#allocation6], %s218_s23 }
  0x76   : > { %p2006_p11 = scmp.ne.s32.totalorder %s1997_s7, 0 }
  0x77   : > { %s1801_s10 = scalar_lea.vmem [#allocation5], %s1324_s26 }
  0x78   : > { %1551 = dma.done.wait (%p2006_p11), %s219_s6, 12416  }
  0x79   : > { %1553 = vsyncadd (%p2006_p11), %s219_s6, 4294954880  ;;  %v267_v0 = vld [vmem:[%s1801_s10] sm:$0xff]  ;;  %v268_v2 = vld [vmem:[%s1801_s10 + $0x8] sm:$0xff]  ;;  %vm885_vm0 = vcmask 523264   ;;  %s1213_s30 = sshll.u32 %s1798_s25, 3  ;;  %s1214_s9 = sshll.u32 %s1798_s25, 6 }
  0x7a   : > { %v271_v1 = vld [vmem:[%s1801_s10 + $0x20] sm:$0xff]  ;;  %v272_v4 = vld [vmem:[%s1801_s10 + $0x28] sm:$0xff]  ;;  %v264_v43 = vld [vmem:[#allocation2 + $0x8] sm:$0xff]  ;;  %s231_s7 = scalar_lea.vmem [#allocation7], %s1213_s30  ;;  %s1921_s11 = scalar_lea.vmem [#allocation8], %s1214_s9 }
  0x7b   : > { %v1216_v3 = vcombine.high %v267_v0, %v271_v1  ;;  %v1215_v5 = vcombine.low %v267_v0, %v271_v1  ;;  %v275_v6 = vld [vmem:[%s1801_s10 + $0x40] sm:$0xff]  ;;  %v1218_v8 = vcombine.high %v268_v2, %v272_v4  ;;  %v1217_v9 = vcombine.low %v268_v2, %v272_v4  ;;  %v276_v11 = vld [vmem:[%s1801_s10 + $0x48] sm:$0xff]  ;;  %s1322_s27 = sshll.u32 %s1572_s15, 10  ;;  %s1086_s19 = sshll.u32 %s1921_s11, 4  ;;  %s1935_s19 = int_to_ptr.vmem [resolvable:$true] %s1086_s19 }
  0x7c   : > { %v279_v7 = vld [vmem:[%s1801_s10 + $0x60] sm:$0xff]  ;;  %v280_v12 = vld [vmem:[%s1801_s10 + $0x68] sm:$0xff]  ;;  %v1831_v46 = vpack.c.bf16 %v264_v43, %v264_v43  ;;  %s1933_s8 = scalar_lea.hbm %s1988_s3, %s1322_s27  ;;  %s1070_s15 = scalar_lea.sflag [#allocation4], %s1798_s25 }
  0x7d   : > { %v1224_v10 = vcombine.high %v275_v6, %v279_v7  ;;  %v283_v13 = vld [vmem:[%s1801_s10 + $0x80] sm:$0xff]  ;;  %889 = vmatprep.subr.bf16.mxu0 %v1216_v3  ;;  %v1226_v14 = vcombine.high %v276_v11, %v280_v12  ;;  %v284_v16 = vld [vmem:[%s1801_s10 + $0x88] sm:$0xff]  ;;  %930 = vmatprep.subr.bf16.mxu1 %v1218_v8  ;;  %v1223_v18 = vcombine.low %v275_v6, %v279_v7  ;;  %s1494_s22 = scalar_lea.vmem %s1935_s19, 1024  ;;  %p2007_p13 = scmp.ne.s32.totalorder %s1998_s28, 0 }
  0x7e   : > { %v287_v15 = vld [vmem:[%s1801_s10 + $0xa0] sm:$0xff]  ;;  %v288_v17 = vld [vmem:[%s1801_s10 + $0xa8] sm:$0xff]  ;;  %890 = vmatpush1.bf16.msra.mxu0 %v1215_v5  ;;  %931 = vmatpush1.bf16.msra.mxu1 %v1217_v9  ;;  %v1225_v19 = vcombine.low %v276_v11, %v280_v12  ;;  %p1495_p10 = scmp.ne.s32.totalorder %s1935_s19, %s1494_s22  ;;  %s1588_s29 = smov [#allocation8]  }
  0x7f   : > { %891 = vmatprep.subr.bf16.mxu0 %v1224_v10  ;;  %v1232_v20 = vcombine.high %v283_v13, %v287_v15  ;;  %932 = vmatprep.subr.bf16.mxu1 %v1226_v14  ;;  %v1234_v21 = vcombine.high %v284_v16, %v288_v17  ;;  %v291_v22 = vld [vmem:[%s1801_s10 + $0xc0] sm:$0xff]  ;;  %v292_v24 = vld [vmem:[%s1801_s10 + $0xc8] sm:$0xff]  ;;  %v1231_v26 = vcombine.low %v283_v13, %v287_v15  ;;  %s1498_s1 = sshll.u32 %s1588_s29, 4  ;;  %s1499_s1 = int_to_ptr.vmem [resolvable:$false] %s1498_s1 }
  0x80   : > { %v295_v23 = vld [vmem:[%s1801_s10 + $0xe0] sm:$0xff]  ;;  %v296_v25 = vld [vmem:[%s1801_s10 + $0xe8] sm:$0xff]  ;;  %v1233_v27 = vcombine.low %v284_v16, %v288_v17  ;;  %1311 = vmatprep.mubr.msk.bf16.mxu0 %vm885_vm0, %v1831_v46  ;;  %1312 = vmatprep.mubr.msk.bf16.mxu1 %vm885_vm0, %v1831_v46  ;;  %p1496_p0 = pnand %p1495_p10, %p2007_p13  ;;  %s1500_s5 = scalar_lea.vmem %s1499_s1, 2048 }
  0x81   : > { %v1240_v28 = vcombine.high %v291_v22, %v295_v23  ;;  %v1242_v29 = vcombine.high %v292_v24, %v296_v25  ;;  %v299_v30 = vld [vmem:[%s1801_s10 + $0x100] sm:$0xff]  ;;  %v300_v32 = vld [vmem:[%s1801_s10 + $0x108] sm:$0xff]  ;;  %v1239_v34 = vcombine.low %v291_v22, %v295_v23  ;;  %v1241_v35 = vcombine.low %v292_v24, %v296_v25  ;;  %p1501_p4 = scmp.lt.s32.totalorder %s1935_s19, %s1499_s1  ;;  %p1502_p1 = scmp.lt.s32.totalorder %s1500_s5, %s1494_s22 }
  0x82   : > { %892 = vmatpush1.bf16.msra.mxu0 %v1223_v18  ;;  %933 = vmatpush1.bf16.msra.mxu1 %v1225_v19  ;;  %v303_v31 = vld [vmem:[%s1801_s10 + $0x120] sm:$0xff]  ;;  %v304_v33 = vld [vmem:[%s1801_s10 + $0x128] sm:$0xff]  ;;  %p1497_p7 = pneg %p1496_p0 }
  0x83   : > { %893 = vmatprep.subr.bf16.mxu0 %v1232_v20  ;;  %934 = vmatprep.subr.bf16.mxu1 %v1234_v21  ;;  %v1248_v36 = vcombine.high %v299_v30, %v303_v31  ;;  %v1250_v37 = vcombine.high %v300_v32, %v304_v33  ;;  %v307_v38 = vld [vmem:[%s1801_s10 + $0x140] sm:$0xff]  ;;  %v308_v40 = vld [vmem:[%s1801_s10 + $0x148] sm:$0xff]  ;;  %v1247_v42 = vcombine.low %v299_v30, %v303_v31  ;;  %p1503_p3 = por %p1502_p1, %p1501_p4 }
  0x84   : > { %v311_v39 = vld [vmem:[%s1801_s10 + $0x160] sm:$0xff]  ;;  %v312_v41 = vld [vmem:[%s1801_s10 + $0x168] sm:$0xff]  ;;  %v1249_v44 = vcombine.low %v300_v32, %v304_v33  ;;  %v269_v32 = vld [vmem:[%s1801_s10 + $0x10] sm:$0xff] }
  0x85   : > { %v1256_v45 = vcombine.high %v307_v38, %v311_v39  ;;  %v1258_v47 = vcombine.high %v308_v40, %v312_v41  ;;  %v315_v48 = vld [vmem:[%s1801_s10 + $0x180] sm:$0xff]  ;;  %v316_v50 = vld [vmem:[%s1801_s10 + $0x188] sm:$0xff]  ;;  %v1255_v52 = vcombine.low %v307_v38, %v311_v39  ;;  %v1257_v53 = vcombine.low %v308_v40, %v312_v41  ;;  %v273_v33 = vld [vmem:[%s1801_s10 + $0x30] sm:$0xff]  ;;  %p1504_p2 = pnand %p1503_p3, %p1497_p7 }
  0x86   : > { %894 = vmatpush1.bf16.msra.mxu0 %v1231_v26  ;;  %935 = vmatpush1.bf16.msra.mxu1 %v1233_v27  ;;  %v319_v49 = vld [vmem:[%s1801_s10 + $0x1a0] sm:$0xff]  ;;  %v320_v51 = vld [vmem:[%s1801_s10 + $0x1a8] sm:$0xff]  ;;  %v1220_v39 = vcombine.high %v269_v32, %v273_v33  ;;  %v277_v41 = vld [vmem:[%s1801_s10 + $0x50] sm:$0xff] }
  0x87   : > { %895 = vmatprep.subr.bf16.mxu0 %v1240_v28  ;;  %936 = vmatprep.subr.bf16.mxu1 %v1242_v29  ;;  %v1264_v54 = vcombine.high %v315_v48, %v319_v49  ;;  %v1266_v55 = vcombine.high %v316_v50, %v320_v51  ;;  %v323_v56 = vld [vmem:[%s1801_s10 + $0x1c0] sm:$0xff]  ;;  %v324_v58 = vld [vmem:[%s1801_s10 + $0x1c8] sm:$0xff]  ;;  %v1263_v60 = vcombine.low %v315_v48, %v319_v49 }
  0x88   : > { %v327_v57 = vld [vmem:[%s1801_s10 + $0x1e0] sm:$0xff]  ;;  %v328_v59 = vld [vmem:[%s1801_s10 + $0x1e8] sm:$0xff]  ;;  %v1265_v61 = vcombine.low %v316_v50, %v320_v51  ;;  %v285_v51 = vld [vmem:[%s1801_s10 + $0x90] sm:$0xff] }
  0x89   : > { %v1272_v62 = vcombine.high %v323_v56, %v327_v57  ;;  %v1274_v63 = vcombine.high %v324_v58, %v328_v59  ;;  %v331_v0 = vld [vmem:[%s1801_s10 + $0x200] sm:$0xff]  ;;  %v332_v2 = vld [vmem:[%s1801_s10 + $0x208] sm:$0xff]  ;;  %v1271_v4 = vcombine.low %v323_v56, %v327_v57  ;;  %v1273_v5 = vcombine.low %v324_v58, %v328_v59  ;;  %v293_v59 = vld [vmem:[%s1801_s10 + $0xd0] sm:$0xff] }
  0x8a   : > { %896 = vmatpush1.bf16.msra.mxu0 %v1239_v34  ;;  %937 = vmatpush1.bf16.msra.mxu1 %v1241_v35  ;;  %v335_v1 = vld [vmem:[%s1801_s10 + $0x220] sm:$0xff]  ;;  %v336_v3 = vld [vmem:[%s1801_s10 + $0x228] sm:$0xff]  ;;  %v270_v34 = vld [vmem:[%s1801_s10 + $0x18] sm:$0xff] }
  0x8b   : > { %897 = vmatprep.subr.bf16.mxu0 %v1248_v36  ;;  %938 = vmatprep.subr.bf16.mxu1 %v1250_v37  ;;  %v1280_v6 = vcombine.high %v331_v0, %v335_v1  ;;  %v1282_v7 = vcombine.high %v332_v2, %v336_v3  ;;  %v339_v8 = vld [vmem:[%s1801_s10 + $0x240] sm:$0xff]  ;;  %v340_v10 = vld [vmem:[%s1801_s10 + $0x248] sm:$0xff]  ;;  %v1279_v12 = vcombine.low %v331_v0, %v335_v1  ;;  %v274_v35 = vld [vmem:[%s1801_s10 + $0x38] sm:$0xff] }
  0x8c   : > { %v343_v9 = vld [vmem:[%s1801_s10 + $0x260] sm:$0xff]  ;;  %v344_v11 = vld [vmem:[%s1801_s10 + $0x268] sm:$0xff]  ;;  %v1281_v13 = vcombine.low %v332_v2, %v336_v3  ;;  %v263_v37 = vld [vmem:[#allocation2] sm:$0xff]  ;;  %v1222_v40 = vcombine.high %v270_v34, %v274_v35  ;;  %v1221_v48 = vcombine.low %v270_v34, %v274_v35 }
  0x8d   : > { %v1288_v14 = vcombine.high %v339_v8, %v343_v9  ;;  %v1290_v15 = vcombine.high %v340_v10, %v344_v11  ;;  %v347_v16 = vld [vmem:[%s1801_s10 + $0x280] sm:$0xff]  ;;  %v348_v18 = vld [vmem:[%s1801_s10 + $0x288] sm:$0xff]  ;;  %v1287_v20 = vcombine.low %v339_v8, %v343_v9  ;;  %v1289_v21 = vcombine.low %v340_v10, %v344_v11  ;;  %v301_v3 = vld [vmem:[%s1801_s10 + $0x110] sm:$0xff] }
  0x8e   : > { %898 = vmatpush1.bf16.msra.mxu0 %v1247_v42  ;;  %939 = vmatpush1.bf16.msra.mxu1 %v1249_v44  ;;  %v351_v17 = vld [vmem:[%s1801_s10 + $0x2a0] sm:$0xff]  ;;  %v352_v19 = vld [vmem:[%s1801_s10 + $0x2a8] sm:$0xff]  ;;  %v281_v42 = vld [vmem:[%s1801_s10 + $0x70] sm:$0xff]  ;;  %v1867_v43 = vpack.c.bf16 %v263_v37, %v263_v37 }
  0x8f   : > { %899 = vmatprep.subr.bf16.mxu0 %v1256_v45  ;;  %940 = vmatprep.subr.bf16.mxu1 %v1258_v47  ;;  %v1296_v22 = vcombine.high %v347_v16, %v351_v17  ;;  %v1298_v23 = vcombine.high %v348_v18, %v352_v19  ;;  %v355_v24 = vld [vmem:[%s1801_s10 + $0x2c0] sm:$0xff]  ;;  %v356_v26 = vld [vmem:[%s1801_s10 + $0x2c8] sm:$0xff]  ;;  %v1295_v28 = vcombine.low %v347_v16, %v351_v17  ;;  %v278_v44 = vld [vmem:[%s1801_s10 + $0x58] sm:$0xff] }
  0x90   : > { %v359_v25 = vld [vmem:[%s1801_s10 + $0x2e0] sm:$0xff]  ;;  %v360_v27 = vld [vmem:[%s1801_s10 + $0x2e8] sm:$0xff]  ;;  %v1297_v29 = vcombine.low %v348_v18, %v352_v19  ;;  %v282_v45 = vld [vmem:[%s1801_s10 + $0x78] sm:$0xff]  ;;  %v1219_v47 = vcombine.low %v269_v32, %v273_v33  ;;  %v1228_v49 = vcombine.high %v277_v41, %v281_v42 }
  0x91   : > { %v1304_v30 = vcombine.high %v355_v24, %v359_v25  ;;  %v1306_v31 = vcombine.high %v356_v26, %v360_v27  ;;  %v1303_v36 = vcombine.low %v355_v24, %v359_v25  ;;  %v1305_v38 = vcombine.low %v356_v26, %v360_v27  ;;  %v309_v10 = vld [vmem:[%s1801_s10 + $0x150] sm:$0xff]  ;;  %v338_v37 = vld [vmem:[%s1801_s10 + $0x238] sm:$0xff] }
  0x92   : > { %900 = vmatpush1.bf16.msra.mxu0 %v1255_v52  ;;  %941 = vmatpush1.bf16.msra.mxu1 %v1257_v53  ;;  %v1230_v50 = vcombine.high %v278_v44, %v282_v45  ;;  %v289_v52 = vld [vmem:[%s1801_s10 + $0xb0] sm:$0xff]  ;;  %v286_v53 = vld [vmem:[%s1801_s10 + $0x98] sm:$0xff]  ;;  %v1229_v56 = vcombine.low %v278_v44, %v282_v45 }
  0x93   : > { %901 = vmatprep.subr.bf16.mxu0 %v1264_v54  ;;  %942 = vmatprep.subr.bf16.mxu1 %v1266_v55  ;;  %v290_v54 = vld [vmem:[%s1801_s10 + $0xb8] sm:$0xff]  ;;  %v1227_v55 = vcombine.low %v277_v41, %v281_v42  ;;  %v1236_v57 = vcombine.high %v285_v51, %v289_v52  ;;  %v313_v11 = vld [vmem:[%s1801_s10 + $0x170] sm:$0xff] }
  0x94   : > { %v1238_v58 = vcombine.high %v286_v53, %v290_v54  ;;  %v1237_v0 = vcombine.low %v286_v53, %v290_v54  ;;  %v1260_v16 = vcombine.high %v309_v10, %v313_v11  ;;  %v317_v18 = vld [vmem:[%s1801_s10 + $0x190] sm:$0xff]  ;;  %v342_v45 = vld [vmem:[%s1801_s10 + $0x258] sm:$0xff] }
  0x95   : > { %v321_v19 = vld [vmem:[%s1801_s10 + $0x1b0] sm:$0xff]  ;;  %v350_v54 = vld [vmem:[%s1801_s10 + $0x298] sm:$0xff] }
  0x96   : > { %902 = vmatpush1.bf16.msra.mxu0 %v1263_v60  ;;  %943 = vmatpush1.bf16.msra.mxu1 %v1265_v61  ;;  %v297_v60 = vld [vmem:[%s1801_s10 + $0xf0] sm:$0xff]  ;;  %v294_v61 = vld [vmem:[%s1801_s10 + $0xd8] sm:$0xff]  ;;  %v1268_v24 = vcombine.high %v317_v18, %v321_v19 }
  0x97   : > { %903 = vmatprep.subr.bf16.mxu0 %v1272_v62  ;;  %944 = vmatprep.subr.bf16.mxu1 %v1274_v63  ;;  %v298_v62 = vld [vmem:[%s1801_s10 + $0xf8] sm:$0xff]  ;;  %v1235_v63 = vcombine.low %v285_v51, %v289_v52  ;;  %v1244_v1 = vcombine.high %v293_v59, %v297_v60  ;;  %v325_v26 = vld [vmem:[%s1801_s10 + $0x1d0] sm:$0xff] }
  0x98   : > { %v1246_v2 = vcombine.high %v294_v61, %v298_v62  ;;  %v329_v27 = vld [vmem:[%s1801_s10 + $0x1f0] sm:$0xff] }
  0x99   : > { %v1276_v32 = vcombine.high %v325_v26, %v329_v27  ;;  %v333_v34 = vld [vmem:[%s1801_s10 + $0x210] sm:$0xff] }
  0x9a   : > { %904 = vmatpush1.bf16.msra.mxu0 %v1271_v4  ;;  %945 = vmatpush1.bf16.msra.mxu1 %v1273_v5  ;;  %v305_v4 = vld [vmem:[%s1801_s10 + $0x130] sm:$0xff]  ;;  %v302_v5 = vld [vmem:[%s1801_s10 + $0x118] sm:$0xff] }
  0x9b   : > { %905 = vmatprep.subr.bf16.mxu0 %v1280_v6  ;;  %946 = vmatprep.subr.bf16.mxu1 %v1282_v7  ;;  %v306_v6 = vld [vmem:[%s1801_s10 + $0x138] sm:$0xff]  ;;  %v1243_v7 = vcombine.low %v293_v59, %v297_v60  ;;  %v1252_v8 = vcombine.high %v301_v3, %v305_v4  ;;  %v337_v35 = vld [vmem:[%s1801_s10 + $0x230] sm:$0xff] }
  0x9c   : > { %v1254_v9 = vcombine.high %v302_v5, %v306_v6  ;;  %v341_v42 = vld [vmem:[%s1801_s10 + $0x250] sm:$0xff] }
  0x9d   : > { %v345_v44 = vld [vmem:[%s1801_s10 + $0x270] sm:$0xff] }
  0x9e   : > { %906 = vmatpush1.bf16.msra.mxu0 %v1279_v12  ;;  %947 = vmatpush1.bf16.msra.mxu1 %v1281_v13  ;;  %v310_v12 = vld [vmem:[%s1801_s10 + $0x158] sm:$0xff]  ;;  %v349_v52 = vld [vmem:[%s1801_s10 + $0x290] sm:$0xff] }
  0x9f   : > { %907 = vmatprep.subr.bf16.mxu0 %v1288_v14  ;;  %948 = vmatprep.subr.bf16.mxu1 %v1290_v15  ;;  %v314_v13 = vld [vmem:[%s1801_s10 + $0x178] sm:$0xff]  ;;  %v1251_v14 = vcombine.low %v301_v3, %v305_v4  ;;  %v1253_v15 = vcombine.low %v302_v5, %v306_v6  ;;  %v353_v53 = vld [vmem:[%s1801_s10 + $0x2b0] sm:$0xff]  ;;  %v365_v6 = vlaneseq }
  0xa0   : > { %v1262_v17 = vcombine.high %v310_v12, %v314_v13  ;;  %v357_v60 = vld [vmem:[%s1801_s10 + $0x2d0] sm:$0xff] }
  0xa2   : > { %908 = vmatpush1.bf16.msra.mxu0 %v1287_v20  ;;  %949 = vmatpush1.bf16.msra.mxu1 %v1289_v21  ;;  %v318_v20 = vld [vmem:[%s1801_s10 + $0x198] sm:$0xff] }
  0xa3   : > { %909 = vmatprep.subr.bf16.mxu0 %v1296_v22  ;;  %950 = vmatprep.subr.bf16.mxu1 %v1298_v23  ;;  %v322_v21 = vld [vmem:[%s1801_s10 + $0x1b8] sm:$0xff]  ;;  %v1259_v22 = vcombine.low %v309_v10, %v313_v11  ;;  %v1261_v23 = vcombine.low %v310_v12, %v314_v13 }
  0xa4   : > { %v1270_v25 = vcombine.high %v318_v20, %v322_v21 }
  0xa6   : > { %910 = vmatpush1.bf16.msra.mxu0 %v1295_v28  ;;  %951 = vmatpush1.bf16.msra.mxu1 %v1297_v29  ;;  %v326_v28 = vld [vmem:[%s1801_s10 + $0x1d8] sm:$0xff] }
  0xa7   : > { %911 = vmatprep.subr.bf16.mxu0 %v1304_v30  ;;  %952 = vmatprep.subr.bf16.mxu1 %v1306_v31  ;;  %v330_v29 = vld [vmem:[%s1801_s10 + $0x1f8] sm:$0xff]  ;;  %v1267_v30 = vcombine.low %v317_v18, %v321_v19  ;;  %v1269_v31 = vcombine.low %v318_v20, %v322_v21 }
  0xa8   : > { %v1278_v33 = vcombine.high %v326_v28, %v330_v29 }
  0xaa   : > { %912 = vmatpush1.bf16.msra.mxu0 %v1303_v36  ;;  %953 = vmatpush1.bf16.msra.mxu1 %v1305_v38  ;;  %v334_v36 = vld [vmem:[%s1801_s10 + $0x218] sm:$0xff]  ;;  %v1275_v38 = vcombine.low %v325_v26, %v329_v27 }
  0xab   : > { %971 = vmatprep.subr.bf16.mxu0 %v1220_v39  ;;  %1012 = vmatprep.subr.bf16.mxu1 %v1222_v40  ;;  %v1277_v39 = vcombine.low %v326_v28, %v330_v29  ;;  %v1284_v40 = vcombine.high %v333_v34, %v337_v35  ;;  %v1286_v41 = vcombine.high %v334_v36, %v338_v37 }
  0xad   : > { %922 = vmatmul.mubr.bf16.vlgmr.msra.gmra.mrb[0].mxu0 %v1867_v43  ;;  %963 = vmatmul.mubr.bf16.vlgmr.msra.gmra.mrb[0].mxu1 %v1867_v43 }
  0xae   : > { %972 = vmatpush1.bf16.msra.mxu0 %v1219_v47  ;;  %1013 = vmatpush1.bf16.msra.mxu1 %v1221_v48  ;;  %v346_v47 = vld [vmem:[%s1801_s10 + $0x278] sm:$0xff]  ;;  %v1283_v48 = vcombine.low %v333_v34, %v337_v35 }
  0xaf   : > { %973 = vmatprep.subr.bf16.mxu0 %v1228_v49  ;;  %1014 = vmatprep.subr.bf16.mxu1 %v1230_v50  ;;  %v1285_v49 = vcombine.low %v334_v36, %v338_v37  ;;  %v1292_v50 = vcombine.high %v341_v42, %v345_v44  ;;  %v1294_v51 = vcombine.high %v342_v45, %v346_v47 }
  0xb0   : > { %1313 = vmatprep.mubr.msk.bf16.mxu0 %vm885_vm0, %v1831_v46  ;;  %1314 = vmatprep.mubr.msk.bf16.mxu1 %vm885_vm0, %v1831_v46  ;;  %v1245_v46 = vcombine.low %v294_v61, %v298_v62  ;;  %v361_v61 = vld [vmem:[%s1801_s10 + $0x2f0] sm:$0xff]  ;;  %v358_v62 = vld [vmem:[%s1801_s10 + $0x2d8] sm:$0xff] }
  0xb1   : > { %v1307_v4 = vcombine.low %v357_v60, %v361_v61 }
  0xb2   : > { %974 = vmatpush1.bf16.msra.mxu0 %v1227_v55  ;;  %1015 = vmatpush1.bf16.msra.mxu1 %v1229_v56  ;;  %v354_v55 = vld [vmem:[%s1801_s10 + $0x2b8] sm:$0xff]  ;;  %v1291_v56 = vcombine.low %v341_v42, %v345_v44 }
  0xb3   : > { %975 = vmatprep.subr.bf16.mxu0 %v1236_v57  ;;  %1016 = vmatprep.subr.bf16.mxu1 %v1238_v58  ;;  %v1293_v57 = vcombine.low %v342_v45, %v346_v47  ;;  %v1300_v58 = vcombine.high %v349_v52, %v353_v53  ;;  %v1302_v59 = vcombine.high %v350_v54, %v354_v55 }
  0xb6   : > { %976 = vmatpush1.bf16.msra.mxu0 %v1235_v63  ;;  %1017 = vmatpush1.bf16.msra.mxu1 %v1237_v0  ;;  %v362_v63 = vld [vmem:[%s1801_s10 + $0x2f8] sm:$0xff]  ;;  %v1299_v0 = vcombine.low %v349_v52, %v353_v53 }
  0xb7   : > { %977 = vmatprep.subr.bf16.mxu0 %v1244_v1  ;;  %1018 = vmatprep.subr.bf16.mxu1 %v1246_v2  ;;  %v1301_v1 = vcombine.low %v350_v54, %v354_v55  ;;  %v1308_v2 = vcombine.high %v357_v60, %v361_v61  ;;  %v1310_v3 = vcombine.high %v358_v62, %v362_v63 }
  0xb8   : > { %v1309_v5 = vcombine.low %v358_v62, %v362_v63 }
  0xba   : > { %978 = vmatpush1.bf16.msra.mxu0 %v1243_v7  ;;  %1019 = vmatpush1.bf16.msra.mxu1 %v1245_v46  ;;  %v366_v7 = vshrl.u32 %v365_v6, 7 }
  0xbb   : > { %979 = vmatprep.subr.bf16.mxu0 %v1252_v8  ;;  %1020 = vmatprep.subr.bf16.mxu1 %v1254_v9  ;;  %v363_v8 = vld [vmem:[%s231_s7] sm:$0xff] }
  0xbc   : > { %v367_v46 = vsub.s32 0, %v366_v7  ;;  %v375_v9 = vsub.s32 2, %v366_v7  ;;  %v371_v10 = vsub.s32 1, %v366_v7  ;;  %v379_v11 = vsub.s32 3, %v366_v7 }
  0xbd   : > { %v395_v34 = vsub.s32 7, %v366_v7 }
  0xbe   : > { %980 = vmatpush1.bf16.msra.mxu0 %v1251_v14  ;;  %1021 = vmatpush1.bf16.msra.mxu1 %v1253_v15  ;;  %v368_v12 = vrot.slane %v363_v8, %v367_v46  ;;  %v376_v13 = vrot.slane %v363_v8, %v375_v9  ;;  %v372_v14 = vrot.slane %v363_v8, %v371_v10 }
  0xbf   : > { %981 = vmatprep.subr.bf16.mxu0 %v1260_v16  ;;  %1022 = vmatprep.subr.bf16.mxu1 %v1262_v17  ;;  %v380_v15 = vrot.slane %v363_v8, %v379_v11 }
  0xc2   : > { %982 = vmatpush1.bf16.msra.mxu0 %v1259_v22  ;;  %1023 = vmatpush1.bf16.msra.mxu1 %v1261_v23 }
  0xc3   : > { %983 = vmatprep.subr.bf16.mxu0 %v1268_v24  ;;  %1024 = vmatprep.subr.bf16.mxu1 %v1270_v25 }
  0xc6   : > { %984 = vmatpush1.bf16.msra.mxu0 %v1267_v30  ;;  %1025 = vmatpush1.bf16.msra.mxu1 %v1269_v31  ;;  %v383_v31 = vsub.s32 4, %v366_v7 }
  0xc7   : > { %985 = vmatprep.subr.bf16.mxu0 %v1276_v32  ;;  %1026 = vmatprep.subr.bf16.mxu1 %v1278_v33  ;;  %v391_v32 = vsub.s32 6, %v366_v7  ;;  %v387_v33 = vsub.s32 5, %v366_v7 }
  0xc8   : > { %v384_v35 = vrot.slane %v363_v8, %v383_v31 }
  0xc9   : > { %v392_v36 = vrot.slane %v363_v8, %v391_v32  ;;  %v388_v37 = vrot.slane %v363_v8, %v387_v33 }
  0xca   : > { %986 = vmatpush1.bf16.msra.mxu0 %v1275_v38  ;;  %1027 = vmatpush1.bf16.msra.mxu1 %v1277_v39  ;;  %v396_v38 = vrot.slane %v363_v8, %v395_v34 }
  0xcb   : > { %987 = vmatprep.subr.bf16.mxu0 %v1284_v40  ;;  %1028 = vmatprep.subr.bf16.mxu1 %v1286_v41 }
  0xce   : > { %988 = vmatpush1.bf16.msra.mxu0 %v1283_v48  ;;  %1029 = vmatpush1.bf16.msra.mxu1 %v1285_v49 }
  0xcf   : > { %989 = vmatprep.subr.bf16.mxu0 %v1292_v50  ;;  %1030 = vmatprep.subr.bf16.mxu1 %v1294_v51 }
  0xd2   : > { %990 = vmatpush1.bf16.msra.mxu0 %v1291_v56  ;;  %1031 = vmatpush1.bf16.msra.mxu1 %v1293_v57 }
  0xd3   : > { %991 = vmatprep.subr.bf16.mxu0 %v1300_v58  ;;  %1032 = vmatprep.subr.bf16.mxu1 %v1302_v59 }
  0xd6   : > { %992 = vmatpush1.bf16.msra.mxu0 %v1299_v0  ;;  %1033 = vmatpush1.bf16.msra.mxu1 %v1301_v1 }
  0xd7   : > { %993 = vmatprep.subr.bf16.mxu0 %v1308_v2  ;;  %1034 = vmatprep.subr.bf16.mxu1 %v1310_v3 }
  0xda   : > { %994 = vmatpush1.bf16.msra.mxu0 %v1307_v4  ;;  %1035 = vmatpush1.bf16.msra.mxu1 %v1309_v5 }
  0xdd   : > { %1004 = vmatmul.mubr.bf16.vlgmr.msra.gmra.mrb[4].mxu0 %v1867_v43  ;;  %1045 = vmatmul.mubr.bf16.vlgmr.msra.gmra.mrb[4].mxu1 %v1867_v43 }
 0x180   : > { %v923_v16 = vpop.f32.mrb[0].mxu0  ;;  %v964_v18 = vpop.f32.mrb[0].mxu1 }
 0x181   : > { %v924_v17 = vadd.f32 %v923_v16, %v368_v12  ;;  %v925_v19 = vpop.f32.mrb[1].mxu0  ;;  %v965_v20 = vadd.f32 %v964_v18, %v376_v13  ;;  %v966_v21 = vpop.f32.mrb[1].mxu1 }
 0x182   : > { %v926_v43 = vadd.f32 %v925_v19, %v372_v14  ;;  %v927_v22 = vpop.f32.mrb[2].mxu0  ;;  %v967_v24 = vadd.f32 %v966_v21, %v380_v15  ;;  %v968_v25 = vpop.f32.mrb[2].mxu1 }
 0x183   : > { %v1053_v23 = vmax.f32 %v924_v17, 0.0  ;;  %v928_v26 = vpop.f32.mrb[3].mxu0  ;;  %v1055_v27 = vmax.f32 %v965_v20, 0.0  ;;  %v969_v29 = vpop.f32.mrb[3].mxu1 }
 0x184   : > { %v1054_v28 = vmax.f32 %v926_v43, 0.0  ;;  %v1056_v30 = vmax.f32 %v967_v24, 0.0 }
 0x185   : > { %1061 = vst [vmem:[%s1921_s11] sm:$0xff] %v1053_v23  ;;  %1063 = vst [vmem:[%s1921_s11 + $0x10] sm:$0xff] %v1055_v27 }
 0x186   : > { %1062 = vst [vmem:[%s1921_s11 + $0x8] sm:$0xff] %v1054_v28  ;;  %1064 = vst [vmem:[%s1921_s11 + $0x18] sm:$0xff] %v1056_v30 }
 0x1b0   : > { %v1005_v39 = vpop.f32.mrb[4].mxu0  ;;  %v1046_v41 = vpop.f32.mrb[4].mxu1 }
 0x1b1   : > { %v1006_v40 = vadd.f32 %v1005_v39, %v384_v35  ;;  %v1007_v42 = vpop.f32.mrb[5].mxu0  ;;  %v1047_v44 = vadd.f32 %v1046_v41, %v392_v36  ;;  %v1048_v47 = vpop.f32.mrb[5].mxu1 }
 0x1b2   : > { %v1008_v45 = vadd.f32 %v1007_v42, %v388_v37  ;;  %v1009_v48 = vpop.f32.mrb[6].mxu0  ;;  %v1049_v50 = vadd.f32 %v1048_v47, %v396_v38  ;;  %v1050_v51 = vpop.f32.mrb[6].mxu1 }
 0x1b3   : > { %v1057_v49 = vmax.f32 %v1006_v40, 0.0  ;;  %v1010_v52 = vpop.f32.mrb[7].mxu0  ;;  %v1059_v53 = vmax.f32 %v1047_v44, 0.0  ;;  %v1051_v55 = vpop.f32.mrb[7].mxu1 }
 0x1b4   : > { %v1058_v54 = vmax.f32 %v1008_v45, 0.0  ;;  %v1060_v56 = vmax.f32 %v1049_v50, 0.0 }
 0x1b5   : > { %1065 = vst [vmem:[%s1921_s11 + $0x20] sm:$0xff] %v1057_v49  ;;  %1067 = vst [vmem:[%s1921_s11 + $0x30] sm:$0xff] %v1059_v53 }
 0x1b6   : > { %1066 = vst [vmem:[%s1921_s11 + $0x28] sm:$0xff] %v1058_v54  ;;  %1068 = vst [vmem:[%s1921_s11 + $0x38] sm:$0xff] %v1060_v56 }
 0x1b7   : > { %1507 = shalt.err (!%p1504_p2)
}
 0x1b8   : > { %s1508_s23 = scalar_lea.hbm %s1933_s8, 1024  ;;  %s1512_s6 = scalar_lea.hbm %s1988_s3, 2048 }
 0x1b9   : > { %p1509_p6 = scmp.ne.s32.totalorder %s1933_s8, %s1508_s23  ;;  %p1513_p8 = scmp.lt.u32.totalorder %s1933_s8, %s1988_s3 }
 0x1ba   : > { %p1514_p5 = scmp.lt.u32.totalorder %s1512_s6, %s1508_s23  ;;  %p1516_p10 = scmp.lt.u32.totalorder %s1508_s23, %s1933_s8 }
 0x1bb   : > { %p1510_p12 = pnand %p1509_p6, %p2007_p13 }
 0x1bc   : > { %p1515_p11 = por %p1514_p5, %p1513_p8 }
 0x1bd   : > { %p1511_p9 = pneg %p1510_p12 }
 0x1be   : > { %p1517_p0 = por %p1516_p10, %p1515_p11 }
 0x1c0   : > { %p1518_p7 = pnand %p1517_p0, %p1511_p9 }
 0x1c2   : > { %1521 = shalt.err (!%p1518_p7)
}
 0x1c3   : > { %1333 = dma.vmem_to_hbm [thread:$0]  (%p2007_p13), %s1935_s19, 1024, %s1933_s8, %s1070_s15  }
 0x1c4 PF: > { %s1098_s7 = sand.u32 1, %s1560_s12   ;;  %p2008_p4 = scmp.ne.s32.totalorder %s1999_s4, 0 }
 0x1c5   : > { %p2009_p1 = scmp.ge.s32.totalorder %s1580_s17, 2  ;;  %s1099_s9 = scalar_lea.sflag [#allocation4], %s1098_s7 }
 0x1c7   : > { %p1347_p3 = pnand %p2009_p1, %p2008_p4 }
 0x1c9   : > { %1555 = dma.done.wait (!%p1347_p3), %s1099_s9, 1024  }
 0x1ca   : > { %1557 = vsyncadd (!%p1347_p3), %s1099_s9, 4294966272  ;;  %s20_s17 = sadd.s32 1, %s1580_s17   ;;  %s2010_s12 = smov %s1564_s13 }
 0x1cb   : > { %p17_p2 = scmp.ge.s32.totalorder %s20_s17, 4   ;;  %s2011_s13 = smov %s1568_s14 }
 0x1cc   : > { %s2012_s14 = smov %s1657_s24  ;;  %s2013_s15 = smov %s1576_s16 }
 0x1cd   : > { %s2014_s16 = smov %s2016_s18  ;;  %19 = sbr.rel (!%p17_p2) target bundleno = 9 (0x9), region = 94 }
 0x1d4   :  { %1104 = vsyncpa [#allocation3], 1 }
 0x1d5   :  { %1106 = vsyncpa [#allocation3 + $0x1], 1 }
 0x1d6   :  { %1107 = vsyncpa [#allocation6], 1 }
 0x1d7   :  { %1109 = vsyncpa [#allocation6 + $0x1], 1 }
 0x1d8   :  { %1110 = vsyncpa [#allocation4], 1 }
 0x1d9   :  { %1112 = vsyncpa [#allocation4 + $0x1], 1 }

</bundles_post_ra>
